<compile_context>
chip_gen: v5e
topology: v5e:2x2
jax: 0.10.0
libtpu: 0.0.40
codegen_flags: <defaults>
</compile_context>

<pallas_src>
import jax
import jax.numpy as jnp
from jax.experimental import pallas as pl
from jax.experimental.pallas import tpu as pltpu

C_IN, C_OUT, K, STRIDE = 6, 2, 3, 2
L_IN = 28
L_OUT = (L_IN - 1) * STRIDE + K        # 57
LANES = 128                            # lane-dense working width
ROWS = 8                               # one f32 vreg worth of sublanes


def _sigmoid(v):
    # numerically stable logistic; exp goes to the EUP (idle slot here)
    e = jnp.exp(-jnp.abs(v))
    return jnp.where(v >= 0, 1.0, e) / (1.0 + e)


def _fused_kernel(x1_ref, x2_ref, w_ref, b_ref, out_ref, v1_buf):
    """x1_ref, x2_ref: (1, C_IN, L_IN) VMEM (full-array blocks, unpadded)
       w_ref         : (8, 16)  VMEM packed ConvT weights
                        rows 0..1: even outputs  [tap0_i | tap2_i]
                        rows 2..3: odd  outputs  [tap1_i |   0   ]
       b_ref         : (8, 128) VMEM bias tile (rows 0..3 = b[o], rest 0)
       out_ref       : (8, 128) VMEM
                        rows 0..1: even output columns  out[:, 2m]   (m = 0..28)
                        rows 2..3: odd  output columns  out[:, 2m+1] (m = 0..27)
       v1_buf        : (8, 128) VMEM scratch (zero-extended v1)
    """
    p = x1_ref[0] * x2_ref[0]                          # (C_IN, L_IN)
    v1_small = jnp.tanh(p) + _sigmoid(p)               # exact v1

    # Zero-extend v1 into a full (8,128) tile.  The zero padding is REQUIRED:
    # the tap-2 shift below relies on lane 127 (and lanes >= L_IN) being zero.
    v1_buf[...] = jnp.zeros_like(v1_buf)
    v1_buf[0:C_IN, 0:L_IN] = v1_small
    v1 = v1_buf[...]                                   # (8, 128)

    # v1s[:, j] = v1[:, j-1]; lane 0 receives the zero that sits in lane 127.
    v1s = pltpu.roll(v1, shift=1, axis=1)

    # ConvTranspose1d(6, 2, 3, stride=2) as ONE tiny MXU matmul:
    #   even[o, m] = sum_i w[i,o,0]*v1[i,m] + w[i,o,2]*v1[i,m-1] + b[o]
    #   odd [o, m] = sum_i w[i,o,1]*v1[i,m]                      + b[o]
    V = jnp.concatenate([v1, v1s], axis=0)             # (16, 128)
    v2 = jnp.dot(w_ref[...], V, preferred_element_type=jnp.float32) + b_ref[...]

    # v3 = sigmoid(v2); single unmasked full-vreg store.
    out_ref[...] = _sigmoid(v2)
    # TODO(synk): the original forward's trailing lines (v6 used before being
    # defined; v7/v8 mix (1,6,28) with (1,2,57)) cannot run in PyTorch either,
    # so only the runnable prefix (v3) is produced.


def pack_conv_params(w, b):
    """Pack ConvTranspose1d params once, outside the per-call jit."""
    w = jnp.asarray(w, jnp.float32)                    # (C_IN, C_OUT, K)
    b = jnp.asarray(b, jnp.float32)                    # (C_OUT,)
    W = jnp.zeros((ROWS, 2 * ROWS), jnp.float32)
    W = W.at[0:C_OUT, 0:C_IN].set(w[:, :, 0].T)                 # even: tap0 @ v1
    W = W.at[0:C_OUT, ROWS:ROWS + C_IN].set(w[:, :, 2].T)       # even: tap2 @ roll(v1)
    W = W.at[C_OUT:2 * C_OUT, 0:C_IN].set(w[:, :, 1].T)         # odd : tap1 @ v1
    bias = jnp.zeros((ROWS,), jnp.float32).at[0:C_OUT].set(b).at[C_OUT:2 * C_OUT].set(b)
    bias_tile = jnp.broadcast_to(bias[:, None], (ROWS, LANES)) + 0.0
    return W, bias_tile


@jax.jit
def model_forward(x1, x2, w_packed, bias_tile):
    """x1, x2: (1, C_IN, L_IN) f32; w_packed: (8,16); bias_tile: (8,128)."""
    outp = pl.pallas_call(
        _fused_kernel,
        out_shape=jax.ShapeDtypeStruct((ROWS, LANES), jnp.float32),
        in_specs=[pl.BlockSpec(memory_space=pltpu.MemorySpace.VMEM)] * 4,
        out_specs=pl.BlockSpec(memory_space=pltpu.MemorySpace.VMEM),
        scratch_shapes=[pltpu.VMEM((ROWS, LANES), jnp.float32)],
    )(x1, x2, w_packed, bias_tile)

    # interleave even/odd halves back to (C_OUT, L_OUT)
    half = L_IN + 1                                             # 29
    even = outp[0:C_OUT, 0:half]                                # (2, 29)
    odd = outp[C_OUT:2 * C_OUT, 0:half]      # last column is a dummy (sliced off)
    v3 = jnp.stack([even, odd], axis=-1).reshape(C_OUT, 2 * half)[:, :L_OUT]
    return v3[None]                                             # (1, 2, 57)


def _reference(x1, x2, w, b):
    """Pure-JAX reference of the same runnable prefix (v3)."""
    p = x1[0] * x2[0]
    v1 = jnp.tanh(p) + jax.nn.sigmoid(p)                        # (C_IN, L_IN)
    out = jnp.zeros((C_OUT, L_OUT), jnp.float32)
    for k in range(K):
        contrib = jnp.einsum("io,il->ol", w[:, :, k], v1,
                             precision=jax.lax.Precision.HIGHEST)
        out = out.at[:, k:k + STRIDE * L_IN:STRIDE].add(contrib)
    v2 = out + b[:, None]
    return jax.nn.sigmoid(v2)[None]


if __name__ == "__main__":
    key = jax.random.PRNGKey(0)
    k1, k2, kw, kb = jax.random.split(key, 4)

    # inputs: torch.randn(1, 6, 28)
    x1 = jax.random.normal(k1, (1, C_IN, L_IN), jnp.float32)
    x2 = jax.random.normal(k2, (1, C_IN, L_IN), jnp.float32)

    # ConvTranspose1d params: weight (C_in, C_out, K), bias (C_out,)
    bound = 1.0 / jnp.sqrt(C_IN * K)
    w = jax.random.uniform(kw, (C_IN, C_OUT, K), jnp.float32, -bound, bound)
    b = jax.random.uniform(kb, (C_OUT,), jnp.float32, -bound, bound)

    w_packed, bias_tile = pack_conv_params(w, b)        # hoisted out of the jit
    out = jax.block_until_ready(model_forward(x1, x2, w_packed, bias_tile))
    ref = _reference(x1, x2, w, b)
    assert out.shape == (1, C_OUT, L_OUT)
    assert jnp.allclose(out, ref, atol=1e-5, rtol=1e-5)
    print("KERNEL_OK")
</pallas_src>

<mosaic_0001>
module attributes {stable_mosaic.version = 11 : i64} {
  func.func @_fused_kernel(%arg0: memref<1x6x28xf32, #tpu.memory_space<vmem>>, %arg1: memref<1x6x28xf32, #tpu.memory_space<vmem>>, %arg2: memref<8x16xf32, #tpu.memory_space<vmem>>, %arg3: memref<8x128xf32, #tpu.memory_space<vmem>>, %arg4: memref<8x128xf32, #tpu.memory_space<vmem>>, %arg5: memref<8x128xf32, #tpu.memory_space<vmem>>) attributes {dimension_semantics = [], scalar_prefetch = 0 : i64, scratch_operands = 1 : i64, tpu.core_type = #tpu.core_type<tc>} {
    %c0 = arith.constant 0 : index
    %c0_0 = arith.constant 0 : index
    %c0_1 = arith.constant 0 : index
    %0 = vector.load %arg0[%c0, %c0_0, %c0_1] : memref<1x6x28xf32, #tpu.memory_space<vmem>>, vector<1x6x28xf32>
    %1 = vector.shape_cast %0 : vector<1x6x28xf32> to vector<6x28xf32>
    %c0_2 = arith.constant 0 : index
    %c0_3 = arith.constant 0 : index
    %c0_4 = arith.constant 0 : index
    %2 = vector.load %arg1[%c0_2, %c0_3, %c0_4] : memref<1x6x28xf32, #tpu.memory_space<vmem>>, vector<1x6x28xf32>
    %3 = vector.shape_cast %2 : vector<1x6x28xf32> to vector<6x28xf32>
    %4 = arith.mulf %1, %3 : vector<6x28xf32>
    %5 = math.tanh %4 : vector<6x28xf32>
    %6 = math.absf %4 : vector<6x28xf32>
    %cst = arith.constant 0.000000e+00 : f32
    %7 = vector.broadcast %cst : f32 to vector<6x28xf32>
    %8 = arith.subf %7, %6 : vector<6x28xf32>
    %9 = math.exp %8 : vector<6x28xf32>
    %cst_5 = arith.constant 0.000000e+00 : f32
    %10 = vector.broadcast %cst_5 : f32 to vector<6x28xf32>
    %11 = arith.cmpf oge, %4, %10 : vector<6x28xf32>
    %cst_6 = arith.constant 1.000000e+00 : f32
    %12 = vector.broadcast %cst_6 : f32 to vector<6x28xf32>
    %13 = arith.select %11, %12, %9 : vector<6x28xi1>, vector<6x28xf32>
    %cst_7 = arith.constant 1.000000e+00 : f32
    %14 = vector.broadcast %cst_7 : f32 to vector<6x28xf32>
    %15 = arith.addf %14, %9 : vector<6x28xf32>
    %16 = arith.divf %13, %15 : vector<6x28xf32>
    %17 = arith.addf %5, %16 : vector<6x28xf32>
    %cst_8 = arith.constant 0.000000e+00 : f32
    %18 = vector.broadcast %cst_8 : f32 to vector<8x128xf32>
    %c0_9 = arith.constant 0 : index
    %c0_10 = arith.constant 0 : index
    %19 = vector.load %arg5[%c0_9, %c0_10] : memref<8x128xf32, #tpu.memory_space<vmem>>, vector<8x128xf32>
    tpu.vector_store %arg5[%c0_9, %c0_10], %18 {strides = array<i32>} : memref<8x128xf32, #tpu.memory_space<vmem>>, vector<8x128xf32>,
    %c0_11 = arith.constant 0 : index
    %c0_12 = arith.constant 0 : index
    %20 = vector.load %arg5[%c0_11, %c0_12] : memref<8x128xf32, #tpu.memory_space<vmem>>, vector<6x28xf32>
    tpu.vector_store %arg5[%c0_11, %c0_12], %17 {strides = array<i32>} : memref<8x128xf32, #tpu.memory_space<vmem>>, vector<6x28xf32>,
    %c0_13 = arith.constant 0 : index
    %c0_14 = arith.constant 0 : index
    %21 = vector.load %arg5[%c0_13, %c0_14] : memref<8x128xf32, #tpu.memory_space<vmem>>, vector<8x128xf32>
    %c1_i32 = arith.constant 1 : i32
    %22 = tpu.dynamic_rotate %21 by %c1_i32 dim 1 : vector<8x128xf32>, i32 -> vector<8x128xf32>
    %23 = tpu.concatenate %21, %22 in 0 : vector<8x128xf32>, vector<8x128xf32> -> vector<16x128xf32>
    %c0_15 = arith.constant 0 : index
    %c0_16 = arith.constant 0 : index
    %24 = vector.load %arg2[%c0_15, %c0_16] : memref<8x16xf32, #tpu.memory_space<vmem>>, vector<8x16xf32>
    %cst_17 = arith.constant dense<0.000000e+00> : vector<8x128xf32>
    %25 = tpu.matmul %24, %23, %cst_17 {dimension_numbers = #tpu.dot_dimension_numbers<[1], [0], [0], [1], [0, 0, 1, 1], [], []>} : vector<8x16xf32>, vector<16x128xf32>, vector<8x128xf32> -> vector<8x128xf32>
    %c0_18 = arith.constant 0 : index
    %c0_19 = arith.constant 0 : index
    %26 = vector.load %arg3[%c0_18, %c0_19] : memref<8x128xf32, #tpu.memory_space<vmem>>, vector<8x128xf32>
    %27 = arith.addf %25, %26 : vector<8x128xf32>
    %28 = math.absf %27 : vector<8x128xf32>
    %cst_20 = arith.constant 0.000000e+00 : f32
    %29 = vector.broadcast %cst_20 : f32 to vector<8x128xf32>
    %30 = arith.subf %29, %28 : vector<8x128xf32>
    %31 = math.exp %30 : vector<8x128xf32>
    %cst_21 = arith.constant 0.000000e+00 : f32
    %32 = vector.broadcast %cst_21 : f32 to vector<8x128xf32>
    %33 = arith.cmpf oge, %27, %32 : vector<8x128xf32>
    %cst_22 = arith.constant 1.000000e+00 : f32
    %34 = vector.broadcast %cst_22 : f32 to vector<8x128xf32>
    %35 = arith.select %33, %34, %31 : vector<8x128xi1>, vector<8x128xf32>
    %cst_23 = arith.constant 1.000000e+00 : f32
    %36 = vector.broadcast %cst_23 : f32 to vector<8x128xf32>
    %37 = arith.addf %36, %31 : vector<8x128xf32>
    %38 = arith.divf %35, %37 : vector<8x128xf32>
    %c0_24 = arith.constant 0 : index
    %c0_25 = arith.constant 0 : index
    %39 = vector.load %arg4[%c0_24, %c0_25] : memref<8x128xf32, #tpu.memory_space<vmem>>, vector<8x128xf32>
    tpu.vector_store %arg4[%c0_24, %c0_25], %38 {strides = array<i32>} : memref<8x128xf32, #tpu.memory_space<vmem>>, vector<8x128xf32>,
    return
  }
}

</mosaic_0001>

<bundles_post_ra>
// kernel: model_forward.1
= control target key start
LH: loop header
LB: loop body
LE: loop exit
PB: predicated region body
PF: predicated region fallthrough
CT: control target
= control target key end

     0   :  { %v116_v5 = vmov 0.0   ;;  %vm45_vm5 = vcmask 226304   ;;  %vm52_vm6 = vcmask 130048   ;;  %s158_s0 = inlined_call_operand.vmem [shape: f32[1,6,28], index: 0, kind: input, shape index: {}]   ;;  %s159_s1 = inlined_call_operand.vmem [shape: f32[1,6,28], index: 1, kind: input, shape index: {}]   ;;  %s160_s2 = inlined_call_operand.vmem [shape: f32[8,16], index: 2, kind: input, shape index: {}]   ;;  %s161_s3 = inlined_call_operand.vmem [shape: f32[8,128], index: 3, kind: input, shape index: {}]   ;;  %s162_s4 = inlined_call_operand.vmem [shape: f32[8,128], index: 4, kind: output, shape index: {}]  }
   0x1   :  { %v17_v0 = vld [vmem:[%s158_s0] sm:$0x3f]  ;;  %44 = vst [vmem:[#allocation2] sm:$0xff] %v116_v5  ;;  %s117_s0 = smov 1  }
   0x2   :  { %v18_v1 = vld [vmem:[%s159_s1] sm:$0x3f] }
   0x3   :  { %v19_v2 = vmul.f32 %v18_v1, %v17_v0  ;;  %v50_v25 = vld [vmem:[%s160_s2] sm:$0xff] }
   0x4   :  { %v51_v26 = vld [vmem:[%s161_s3] sm:$0xff] }
   0x5   :  { %v21_v3 = vand.u32 2147483647, %v19_v2  ;;  %vm25_vm2 = vcmp.ge.f32.partialorder %v19_v2, 0.0 }
   0x7   :  { %v22_v4 = vsub.f32 0.0, %v21_v3 }
   0x9   :  { %v23_v6 = vmul.f32 1.442695, %v22_v4 }
   0xb   :  { %106 = vpow2.f32 %v23_v6 }
  0x11   :  { %v107_v7 = vpop.eup %106 }
  0x12   :  { %v27_v8 = vadd.f32 1.0, %v107_v7  ;;  %v26_v17 = vsel %vm25_vm2, 1.0, %v107_v7 }
  0x14   :  { %108 = vrcp.f32 %v27_v8  ;;  %v39_v11 = vand.u32 2147483648, %v27_v8  ;;  %vm33_vm0 = vweird.f32 %v27_v8  ;;  %v37_v13 = vand.u32 2147483647, %v27_v8 }
  0x15   :  { %110 = vtanh.f32 %v19_v2 }
  0x16   :  { %v40_v15 = vor.u32 1.1754944e-38, %v39_v11  ;;  %vm38_vm4 = vcmp.eq.f32.partialorder %v37_v13, 8.507059e+37 }
  0x1a   :  { %v109_v9 = vpop.eup %108 }
  0x1b   :  { %v29_v10 = vmul.f32 %v109_v9, %v27_v8  ;;  %vm34_vm1 = vweird.f32 %v109_v9  ;;  %v111_v19 = vpop.eup %110 }
  0x1c   :  { %vm35_vm3 = vmor %vm33_vm0, %vm34_vm1 }
  0x1d   :  { %v30_v12 = vsub.f32 1.0, %v29_v10 }
  0x1f   :  { %v31_v14 = vmul.f32 %v109_v9, %v30_v12 }
  0x21   :  { %v32_v16 = vadd.f32 %v109_v9, %v31_v14 }
  0x23   :  { %v36_v18 = vsel %vm35_vm3, %v109_v9, %v32_v16 }
  0x24   :  { %v41_v20 = vsel %vm38_vm4, %v40_v15, %v36_v18 }
  0x25   :  { %v42_v21 = vmul.f32 %v41_v20, %v26_v17 }
  0x27   :  { %v43_v22 = vadd.f32 %v111_v19, %v42_v21 }
  0x29   :  { %46 = vst.msk [vmem:[#allocation2] sm:$0x3f] %vm45_vm5, %v43_v22 }
  0x30   :  { %v47_v23 = vld [vmem:[#allocation2] sm:$0xff] }
  0x31   :  { %48 = vrot.lane.b32.xlu0 %v47_v23, %s117_s0 }
  0xa3   :  { %v49_v24 = vpop.permute.xlu0 %48 }
  0xa4   :  { %70 = vmatpush.msra.mxu0 %v49_v24 }
  0xa6   :  { %71 = vmatpush.msra.mxu0 %v47_v23 }
  0xa7   :  { %103 = vmatmul.msk.f32.vlgmr.msra.gmra.mxu0 %vm52_vm6, %v50_v25 }
 0x124   :  { %v73_v27 = vpop.f32.mrf.mxu0 }
 0x125   :  { %v74_v28 = vadd.f32 %v73_v27, %v51_v26 }
 0x127   :  { %v76_v29 = vand.u32 2147483647, %v74_v28  ;;  %vm80_vm10 = vcmp.ge.f32.partialorder %v74_v28, 0.0 }
 0x129   :  { %v77_v30 = vsub.f32 0.0, %v76_v29 }
 0x12b   :  { %v78_v31 = vmul.f32 1.442695, %v77_v30 }
 0x12d   :  { %112 = vpow2.f32 %v78_v31 }
 0x133   :  { %v113_v32 = vpop.eup %112 }
 0x134   :  { %v82_v33 = vadd.f32 1.0, %v113_v32  ;;  %v81_v43 = vsel %vm80_vm10, 1.0, %v113_v32 }
 0x136   :  { %114 = vrcp.f32 %v82_v33  ;;  %v94_v37 = vand.u32 2147483648, %v82_v33  ;;  %v92_v39 = vand.u32 2147483647, %v82_v33  ;;  %vm88_vm8 = vweird.f32 %v82_v33 }
 0x138   :  { %v95_v41 = vor.u32 1.1754944e-38, %v94_v37  ;;  %vm93_vm11 = vcmp.eq.f32.partialorder %v92_v39, 8.507059e+37 }
 0x13c   :  { %v115_v34 = vpop.eup %114 }
 0x13d   :  { %v84_v35 = vmul.f32 %v115_v34, %v82_v33  ;;  %vm89_vm7 = vweird.f32 %v115_v34 }
 0x13e   :  { %vm90_vm9 = vmor %vm88_vm8, %vm89_vm7 }
 0x13f   :  { %v85_v36 = vsub.f32 1.0, %v84_v35 }
 0x141   :  { %v86_v38 = vmul.f32 %v115_v34, %v85_v36 }
 0x143   :  { %v87_v40 = vadd.f32 %v115_v34, %v86_v38 }
 0x145   :  { %v91_v42 = vsel %vm90_vm9, %v115_v34, %v87_v40 }
 0x146   :  { %v96_v44 = vsel %vm93_vm11, %v95_v41, %v91_v42 }
 0x147   :  { %v97_v45 = vmul.f32 %v96_v44, %v81_v43 }
 0x149   :  { %98 = vst [vmem:[%s162_s4] sm:$0xff] %v97_v45 }

</bundles_post_ra>
